<compile_context>
chip_gen: v7x
topology: tpu7x:2x2x1
jax: 0.10.0
libtpu: 0.0.40
codegen_flags: <defaults>
</compile_context>

<pallas_src>
import functools

import jax
import jax.numpy as jnp
from jax.experimental import pallas as pl
from jax.experimental.pallas import tpu as pltpu


def _round_up(x, m):
    return (x + m - 1) // m * m


def _choose_vocab_tile(v):
    """Lane-dense vocab tiling: V padded to a multiple of 128; tiles as wide
    as reasonable to amortize the ~0.35us per-grid-step overhead."""
    v128 = _round_up(v, 128)
    if v128 <= 1024:
        return v128, v128          # small vocab: single full-width tile
    tn = 512
    return _round_up(v128, tn), tn


def logits_kernel(x_ref, w_ref, b_ref, out_ref):
    """One grid step: logits for one TN-wide slab of the (padded) vocabulary.

    x_ref   : VMEM [B, D]    pooled context embeddings (resident across grid)
    w_ref   : VMEM [D, TN]   pre-transposed linear weight tile
    b_ref   : VMEM [1, TN]   bias tile
    out_ref : VMEM [B, TN]   logits tile
    """
    acc = jnp.dot(x_ref[...], w_ref[...], preferred_element_type=jnp.float32)
    out_ref[...] = (acc + b_ref[...]).astype(out_ref.dtype)


def prepare_params(emb_table, lin_w, lin_b):
    """One-time parameter layout plumbing (NOT per forward call): transpose
    the Linear weight to [D, V] and zero-pad the vocab dim to the tile grid."""
    v, d = lin_w.shape
    v_pad, tn = _choose_vocab_tile(v)
    w_t = jnp.pad(lin_w.T, ((0, 0), (0, v_pad - v)))           # [D, V_pad]
    b = jnp.pad(lin_b, (0, v_pad - v)).reshape(1, v_pad)       # [1, V_pad]
    return emb_table, w_t, b, tn


def word2vec_forward(context, emb_table, w_t, b, *, tn, vocab_size):
    """context: [B, C] int; emb_table: [V, D]; w_t: [D, V_pad] (pre-transposed,
    padded); b: [1, V_pad].  Returns logits [B, V] float32."""
    B, C = context.shape
    V, D = emb_table.shape
    Vp = w_t.shape[1]

    # Embedding gather + mean over the context window, hoisted out of the
    # vocab-tiled kernel (no per-tile recompute; table never enters VMEM).
    # Clamp indices so an out-of-range token cannot cause an OOB gather.
    idx = jnp.clip(context, 0, V - 1)
    pooled = emb_table[idx].astype(jnp.float32).mean(axis=1)    # [B, D] f32
    x = pooled.astype(w_t.dtype)

    # Explicit VMEM budget: double-buffered weight/bias/out tiles + activations.
    wb = w_t.dtype.itemsize
    vmem_needed = (2 * D * tn * wb          # weight tiles
                   + 2 * B * tn * 4         # output tiles (f32)
                   + 2 * tn * b.dtype.itemsize
                   + 2 * B * D * wb)        # pooled activations
    vmem_limit = int(min(max(4 * vmem_needed, 8 << 20), 100 << 20))

    logits = pl.pallas_call(
        logits_kernel,
        out_shape=jax.ShapeDtypeStruct((B, Vp), jnp.float32),
        grid=(Vp // tn,),
        in_specs=[
            pl.BlockSpec((B, D), lambda j: (0, 0)),     # pooled acts (resident)
            pl.BlockSpec((D, tn), lambda j: (0, j)),    # weight tile [D, TN]
            pl.BlockSpec((1, tn), lambda j: (0, j)),    # bias tile (tiny DMA)
        ],
        out_specs=pl.BlockSpec((B, tn), lambda j: (0, j)),
        compiler_params=pltpu.CompilerParams(
            dimension_semantics=("parallel",),
            vmem_limit_bytes=vmem_limit),
    )(x, w_t, b)

    return logits[:, :vocab_size]


def reference_forward(context, emb_table, lin_w, lin_b):
    embeds = emb_table[context]              # [B, C, D]
    out = jnp.mean(embeds, axis=1)           # [B, D]
    return out @ lin_w.T + lin_b             # [B, V]


if __name__ == "__main__":
    VOCAB_SIZE = 128
    EMBEDDING_DIM = 32
    BATCH = 8
    CONTEXT_LEN = 6

    key = jax.random.PRNGKey(0)
    k_ctx, k_emb, k_w, k_b = jax.random.split(key, 4)

    context = jax.random.randint(k_ctx, (BATCH, CONTEXT_LEN), 0, VOCAB_SIZE,
                                 dtype=jnp.int32)
    # deterministic synthetic parameters (roughly matching PyTorch init scales)
    emb_table = jax.random.normal(k_emb, (VOCAB_SIZE, EMBEDDING_DIM),
                                  dtype=jnp.float32)
    bound = 1.0 / (EMBEDDING_DIM ** 0.5)
    lin_w = jax.random.uniform(k_w, (VOCAB_SIZE, EMBEDDING_DIM),
                               minval=-bound, maxval=bound, dtype=jnp.float32)
    lin_b = jax.random.uniform(k_b, (VOCAB_SIZE,),
                               minval=-bound, maxval=bound, dtype=jnp.float32)

    # One-time parameter prep (transpose + pad), hoisted out of the call path.
    emb_p, w_t, b_p, tn = prepare_params(emb_table, lin_w, lin_b)

    fwd = jax.jit(functools.partial(word2vec_forward, tn=tn,
                                    vocab_size=VOCAB_SIZE))
    out = fwd(context, emb_p, w_t, b_p)
    out = jax.block_until_ready(out)

    ref = reference_forward(context, emb_table, lin_w, lin_b)
    assert out.shape == (BATCH, VOCAB_SIZE)
    assert jnp.allclose(out, ref, atol=2e-4, rtol=2e-4), "mismatch vs reference"

    print("KERNEL_OK")
</pallas_src>

<mosaic_0001>
module attributes {stable_mosaic.version = 11 : i64} {
  func.func @logits_kernel(%arg0: i32, %arg1: memref<8x32xf32, #tpu.memory_space<vmem>>, %arg2: memref<32x128xf32, #tpu.memory_space<vmem>>, %arg3: memref<1x128xf32, #tpu.memory_space<vmem>>, %arg4: memref<8x128xf32, #tpu.memory_space<vmem>>) attributes {dimension_semantics = [#tpu.dimension_semantics<parallel>], iteration_bounds = array<i64: 1>, scalar_prefetch = 0 : i64, scratch_operands = 0 : i64, tpu.core_type = #tpu.core_type<tc>, window_params = [{pipeline_mode = #tpu.pipeline_mode<synchronous>, transform_indices = @transform_0, window_bounds = array<i64: 8, 32>}, {transform_indices = @transform_1, window_bounds = array<i64: 32, 128>}, {transform_indices = @transform_2, window_bounds = array<i64: 1, 128>}, {transform_indices = @transform_3, window_bounds = array<i64: 8, 128>}]} {
    %c0 = arith.constant 0 : index
    %c0_0 = arith.constant 0 : index
    %0 = vector.load %arg1[%c0, %c0_0] : memref<8x32xf32, #tpu.memory_space<vmem>>, vector<8x32xf32>
    %c0_1 = arith.constant 0 : index
    %c0_2 = arith.constant 0 : index
    %1 = vector.load %arg2[%c0_1, %c0_2] : memref<32x128xf32, #tpu.memory_space<vmem>>, vector<32x128xf32>
    %cst = arith.constant dense<0.000000e+00> : vector<8x128xf32>
    %2 = tpu.matmul %0, %1, %cst {dimension_numbers = #tpu.dot_dimension_numbers<[1], [0], [0], [1], [0, 0, 1, 1], [], []>} : vector<8x32xf32>, vector<32x128xf32>, vector<8x128xf32> -> vector<8x128xf32>
    %c0_3 = arith.constant 0 : index
    %c0_4 = arith.constant 0 : index
    %3 = vector.load %arg3[%c0_3, %c0_4] : memref<1x128xf32, #tpu.memory_space<vmem>>, vector<1x128xf32>
    %4 = vector.broadcast %3 : vector<1x128xf32> to vector<8x128xf32>
    %5 = arith.addf %2, %4 : vector<8x128xf32>
    %c0_5 = arith.constant 0 : index
    %c0_6 = arith.constant 0 : index
    %6 = vector.load %arg4[%c0_5, %c0_6] : memref<8x128xf32, #tpu.memory_space<vmem>>, vector<8x128xf32>
    tpu.vector_store %arg4[%c0_5, %c0_6], %5 {strides = array<i32>} : memref<8x128xf32, #tpu.memory_space<vmem>>, vector<8x128xf32>,
    return
  }
  func.func @transform_0(%arg0: i32) -> (i32, i32) {
    %c0_i32 = arith.constant 0 : i32
    %c0_i32_0 = arith.constant 0 : i32
    %c0_i32_1 = arith.constant 0 : i32
    return %c0_i32, %c0_i32_0 : i32, i32
  }
  func.func @transform_1(%arg0: i32) -> (i32, i32) {
    %c0_i32 = arith.constant 0 : i32
    %c0_i32_0 = arith.constant 0 : i32
    return %c0_i32, %arg0 : i32, i32
  }
  func.func @transform_2(%arg0: i32) -> (i32, i32) {
    %c0_i32 = arith.constant 0 : i32
    %c0_i32_0 = arith.constant 0 : i32
    return %c0_i32, %arg0 : i32, i32
  }
  func.func @transform_3(%arg0: i32) -> (i32, i32) {
    %c0_i32 = arith.constant 0 : i32
    %c0_i32_0 = arith.constant 0 : i32
    return %c0_i32, %arg0 : i32, i32
  }
}

</mosaic_0001>

<bundles_post_ra>
// kernel: word2vec_forward.1
= control target key start
LH: loop header
LB: loop body
LE: loop exit
PB: predicated region body
PF: predicated region fallthrough
CT: control target
= control target key end

     0   :  { %v168_v3 = vmov 0.0|0.0   ;;  %vm169_vm0 = vmmov 0   ;;  %v170_v6 = vmov 0.0   ;;  %s222_s0 = inlined_call_operand.vmem [shape: f32[8,32], index: 0, kind: input, shape index: {}]   ;;  %s223_s1 = inlined_call_operand.vmem [shape: f32[32,128], index: 1, kind: input, shape index: {}]   ;;  %s224_s2 = inlined_call_operand.vmem [shape: f32[1,128], index: 2, kind: input, shape index: {}]   ;;  %s225_s3 = inlined_call_operand.hbm [shape: f32[8,128], index: 3, kind: output, shape index: {}]  }
   0x1   :  { %v16_v0 = vld [vmem:[%s223_s1] sm:$0xff]  ;;  %v17_v1 = vld [vmem:[%s223_s1 + $0x8] sm:$0xff]  ;;  %v18_v2 = vld [vmem:[%s223_s1 + $0x10] sm:$0xff]  ;;  %134 = vmatprep.subr.bf16.mxu0 %v168_v3  ;;  %131 = vmatprep.mubr.msk.f32.mxu0 %vm169_vm0, %v170_v6 }
   0x2   :  { %v135_v4 = vpack.c.bf16 %v17_v1, %v16_v0  ;;  %v19_v5 = vld [vmem:[%s223_s1 + $0x18] sm:$0xff] }
   0x3   :  { %8 = vsyncpa [#allocation3], 0  ;;  %v138_v7 = vpack.c.bf16 %v19_v5, %v18_v2  ;;  %v15_v8 = vld [vmem:[%s222_s0] sm:$0xff]  ;;  %vm27_vm1 = vcmask 261120   ;;  %s171_s24 = smov [#allocation2]  }
   0x4   :  { %136 = vmatpush3.bf16.msra.mxu0 %v135_v4  ;;  %v116_v9 = vld [vmem:[%s224_s2] ss:$0 sm:$0xff]  ;;  %s108_s1 = sshll.u32 %s171_s24, 4  ;;  %s109_s1 = int_to_ptr.vmem [resolvable:$true] %s108_s1 }
   0x5   :  { %137 = vmatprep.subr.bf16.mxu0 %v168_v3  ;;  %s144_s25 = scalar_lea.vmem %s109_s1, 128  ;;  %p149_p1 = scmp.lt.s32.totalorder %s109_s1, %s109_s1 }
   0x6   :  { %p145_p0 = scmp.ne.s32.totalorder %s109_s1, %s144_s25  ;;  %p150_p2 = scmp.lt.s32.totalorder %s144_s25, %s144_s25 }
   0x8   :  { %139 = vmatpush3.bf16.msra.mxu0 %v138_v7  ;;  %p151_p3 = por %p150_p2, %p149_p1 }
   0xa   :  { %p152_p4 = pnand %p151_p3, %p145_p0 }
   0xb   :  { %132 = vmatmul.mubr.msk.f32.vlgmr.msra.gmra.mrb[0].mxu0 %vm27_vm1, %v15_v8 }
  0xde   :  { %v97_v10 = vpop.f32.mrb[0].mxu0 }
  0xdf   :  { %v98_v11 = vadd.f32 %v116_v9, %v97_v10  ;;  %v133_v12 = vpop.f32.mrb[1].mxu0 }
  0xe1   :  { %101 = vst [vmem:[#allocation2] sm:$0xff] %v98_v11 }
  0xe2   :  { %155 = shalt.err (!%p152_p4)
}
  0xe3   :  { %s156_s27 = scalar_lea.hbm %s225_s3, 128 }
  0xe4   :  { %p157_p5 = scmp.ne.s32.totalorder %s225_s3, %s156_s27  ;;  %p160_p6 = scmp.lt.u32.totalorder %s156_s27, %s225_s3 }
  0xe6   :  { %p162_p7 = pnand %p160_p6, %p157_p5 }
  0xe8   :  { %165 = shalt.err (!%p162_p7)
}
  0xe9   :  { %111 = dma.vmem_to_hbm [thread:$0]  %s109_s1, 128, %s225_s3, [#allocation3]  }
  0xea   :  { %166 = dma.done.wait [#allocation3], 128  }
  0xeb   :  { %167 = vsyncadd [#allocation3], 4294967168 }
  0xec   :  { %115 = vsyncpa [#allocation3], 1 }

</bundles_post_ra>
